<compile_context>
chip_gen: v5e
topology: v5e:2x2
jax: 0.10.0
libtpu: 0.0.40
codegen_flags: <defaults>
</compile_context>

<pallas_src>
import functools

import jax
import jax.numpy as jnp
from jax.experimental import pallas as pl
from jax.experimental.pallas import tpu as pltpu


def _residual_block_kernel(x_ref, w1_ref, b1_ref, g1_ref, be1_ref,
                           w2_ref, b2_ref, g2_ref, be2_ref, o_ref, *, eps):
    """One (batch, seq-tile) block in NCL layout: block view is (C, Lt)."""
    x = x_ref[0]                                    # (C, Lt), input dtype
    x_f32 = x.astype(jnp.float32)

    # ---- conv1 (kernel_size == 1): channel-mixing matmul on the MXU --------
    h = jnp.dot(w1_ref[...], x.astype(jnp.bfloat16),
                preferred_element_type=jnp.float32)          # (C, Lt) f32
    h = h + b1_ref[...]                                       # (C,1) bcast

    # ---- LayerNorm over channels (sublane axis), fused single pass + ReLU --
    mu = jnp.mean(h, axis=0, keepdims=True)                   # (1, Lt)
    var = jnp.mean(h * h, axis=0, keepdims=True) - mu * mu
    h = (h - mu) * jax.lax.rsqrt(var + eps)
    h = jnp.maximum(h * g1_ref[...] + be1_ref[...], 0.0)

    # ---- conv2 + LayerNorm2 + ReLU -----------------------------------------
    h2 = jnp.dot(w2_ref[...], h.astype(jnp.bfloat16),
                 preferred_element_type=jnp.float32)
    h2 = h2 + b2_ref[...]
    mu2 = jnp.mean(h2, axis=0, keepdims=True)
    var2 = jnp.mean(h2 * h2, axis=0, keepdims=True) - mu2 * mu2
    h2 = (h2 - mu2) * jax.lax.rsqrt(var2 + eps)
    h2 = jnp.maximum(h2 * g2_ref[...] + be2_ref[...], 0.0)

    # ---- residual ------------------------------------------------------------
    o_ref[0] = (h2 + x_f32).astype(o_ref.dtype)


def residual_block_forward(x_ncl, params, *, kernel_size, dilation, eps=1e-5):
    """x_ncl: (batch, channels, seq_len) — PyTorch Conv1d layout, kept as-is."""
    B, c_in, L = x_ncl.shape
    w1, b1, g1, be1, w2, b2, g2, be2 = params
    c_out = w1.shape[0]
    pad = dilation * (kernel_size - 1)

    # `out + x` is only shape-valid when the convs preserve seq_len
    # (padding == 0, i.e. kernel_size == 1).  PyTorch raises otherwise; so do we.
    if pad != 0:
        raise ValueError(
            "ResidualBlock forward is only shape-valid for kernel_size == 1 "
            f"(got kernel_size={kernel_size}, dilation={dilation}).")
    if c_out != c_in:
        raise ValueError("Residual add requires out_channels == in_channels.")

    # 1x1 conv weights -> (Cout, Cin) matrices, bf16 operands for the MXU.
    w1m = w1[:, :, 0].astype(jnp.bfloat16)
    w2m = w2[:, :, 0].astype(jnp.bfloat16)
    # Per-channel params as (C, 1) columns: broadcast along the lane (seq) axis.
    col = lambda v: v.reshape(-1, 1).astype(jnp.float32)
    b1c, g1c, be1c = col(b1), col(g1), col(be1)
    b2c, g2c, be2c = col(b2), col(g2), col(be2)

    # Lane-dense sequence tiling: whole L if small, else the largest
    # 128-multiple tile that divides L (keeps per-block VMEM to a few MiB,
    # comfortably inside v7x's smaller budget).
    lt = L
    for cand in (2048, 1024, 512, 256):
        if L > cand and L % cand == 0:
            lt = cand
            break
    n_lt = L // lt

    kernel = functools.partial(_residual_block_kernel, eps=eps)

    def param_spec(shape):
        return pl.BlockSpec(shape, lambda b, l: (0, 0))

    out = pl.pallas_call(
        kernel,
        out_shape=jax.ShapeDtypeStruct((B, c_out, L), x_ncl.dtype),
        grid_spec=pltpu.PrefetchScalarGridSpec(
            num_scalar_prefetch=0,
            grid=(B, n_lt),
            in_specs=[
                pl.BlockSpec((1, c_in, lt), lambda b, l: (b, 0, l)),   # x
                param_spec((c_out, c_in)),                             # W1
                param_spec((c_out, 1)),                                # b1
                param_spec((c_out, 1)), param_spec((c_out, 1)),        # LN1 g/b
                param_spec((c_out, c_out)),                            # W2
                param_spec((c_out, 1)),                                # b2
                param_spec((c_out, 1)), param_spec((c_out, 1)),        # LN2 g/b
            ],
            out_specs=pl.BlockSpec((1, c_out, lt), lambda b, l: (b, 0, l)),
        ),
        compiler_params=pltpu.CompilerParams(
            dimension_semantics=("parallel", "parallel")),
    )(x_ncl, w1m, b1c, g1c, be1c, w2m, b2c, g2c, be2c)
    return out


def init_params(key, c_in, c_out, kernel_size):
    k1, k2, k3, k4 = jax.random.split(key, 4)
    w1 = 0.1 * jax.random.normal(k1, (c_out, c_in, kernel_size), jnp.float32)
    b1 = 0.1 * jax.random.normal(k2, (c_out,), jnp.float32)
    w2 = 0.1 * jax.random.normal(k3, (c_out, c_out, kernel_size), jnp.float32)
    b2 = 0.1 * jax.random.normal(k4, (c_out,), jnp.float32)
    g1 = jnp.ones((c_out,), jnp.float32)
    be1 = jnp.zeros((c_out,), jnp.float32)
    g2 = jnp.ones((c_out,), jnp.float32)
    be2 = jnp.zeros((c_out,), jnp.float32)
    return (w1, b1, g1, be1, w2, b2, g2, be2)


def ref_forward(x, params, *, kernel_size, dilation, eps=1e-5):
    """Pure-JAX reference mirroring the PyTorch forward (x: (B, C, L)).

    Conv operands are cast to bfloat16 with f32 accumulation to mirror the
    kernel's MXU numerics, so the comparison tolerance can stay tight.
    """
    w1, b1, g1, be1, w2, b2, g2, be2 = params
    pad = dilation * (kernel_size - 1)

    def conv(inp, w, b):
        out = jax.lax.conv_general_dilated(
            inp.astype(jnp.bfloat16), w.astype(jnp.bfloat16),
            window_strides=(1,), padding=[(pad, pad)],
            rhs_dilation=(dilation,), dimension_numbers=("NCH", "OIH", "NCH"),
            preferred_element_type=jnp.float32)
        return out + b[None, :, None]

    def ln(inp, g, be):
        y = jnp.transpose(inp, (0, 2, 1))
        mu = y.mean(-1, keepdims=True)
        var = ((y - mu) ** 2).mean(-1, keepdims=True)
        y = (y - mu) / jnp.sqrt(var + eps) * g + be
        return jnp.transpose(y, (0, 2, 1))

    out = jnp.maximum(ln(conv(x, w1, b1), g1, be1), 0.0)
    out = jnp.maximum(ln(conv(out, w2, b2), g2, be2), 0.0)
    return out + x


if __name__ == "__main__":
    key = jax.random.PRNGKey(0)
    kx, kp = jax.random.split(key)

    # kernel_size=1 is the only configuration for which the original module's
    # `out + x` is shape-valid (padding would otherwise lengthen the sequence).
    B, C, L = 2, 32, 16
    kernel_size, dilation = 1, 2

    x = jax.random.normal(kx, (B, C, L), jnp.float32)
    params = init_params(kp, C, C, kernel_size)

    out = residual_block_forward(x, params, kernel_size=kernel_size,
                                 dilation=dilation)
    out = jax.block_until_ready(out)

    ref = ref_forward(x, params, kernel_size=kernel_size, dilation=dilation)
    assert out.shape == (B, C, L), out.shape
    # Tolerance covers bf16-operand matmuls (f32 accumulate) vs the reference's
    # equally-bf16 conv path; real bugs produce O(1) errors.
    err = float(jnp.max(jnp.abs(out - ref)))
    assert err < 5e-3, f"max abs err {err}"
    print("KERNEL_OK")
</pallas_src>

<mosaic_0001>
module attributes {stable_mosaic.version = 11 : i64} {
  func.func @_residual_block_kernel(%arg0: i32, %arg1: i32, %arg2: memref<1x32x16xf32, #tpu.memory_space<vmem>>, %arg3: memref<32x32xbf16, #tpu.memory_space<vmem>>, %arg4: memref<32x1xf32, #tpu.memory_space<vmem>>, %arg5: memref<32x1xf32, #tpu.memory_space<vmem>>, %arg6: memref<32x1xf32, #tpu.memory_space<vmem>>, %arg7: memref<32x32xbf16, #tpu.memory_space<vmem>>, %arg8: memref<32x1xf32, #tpu.memory_space<vmem>>, %arg9: memref<32x1xf32, #tpu.memory_space<vmem>>, %arg10: memref<32x1xf32, #tpu.memory_space<vmem>>, %arg11: memref<1x32x16xf32, #tpu.memory_space<vmem>>) attributes {dimension_semantics = [#tpu.dimension_semantics<parallel>, #tpu.dimension_semantics<parallel>], iteration_bounds = array<i64: 2, 1>, scalar_prefetch = 0 : i64, scratch_operands = 0 : i64, tpu.core_type = #tpu.core_type<tc>, window_params = [{transform_indices = @transform_0, window_bounds = array<i64: 1, 32, 16>}, {pipeline_mode = #tpu.pipeline_mode<synchronous>, transform_indices = @transform_1, window_bounds = array<i64: 32, 32>}, {pipeline_mode = #tpu.pipeline_mode<synchronous>, transform_indices = @transform_2, window_bounds = array<i64: 32, 1>}, {pipeline_mode = #tpu.pipeline_mode<synchronous>, transform_indices = @transform_3, window_bounds = array<i64: 32, 1>}, {pipeline_mode = #tpu.pipeline_mode<synchronous>, transform_indices = @transform_4, window_bounds = array<i64: 32, 1>}, {pipeline_mode = #tpu.pipeline_mode<synchronous>, transform_indices = @transform_5, window_bounds = array<i64: 32, 32>}, {pipeline_mode = #tpu.pipeline_mode<synchronous>, transform_indices = @transform_6, window_bounds = array<i64: 32, 1>}, {pipeline_mode = #tpu.pipeline_mode<synchronous>, transform_indices = @transform_7, window_bounds = array<i64: 32, 1>}, {pipeline_mode = #tpu.pipeline_mode<synchronous>, transform_indices = @transform_8, window_bounds = array<i64: 32, 1>}, {transform_indices = @transform_9, window_bounds = array<i64: 1, 32, 16>}]} {
    %c0 = arith.constant 0 : index
    %c0_0 = arith.constant 0 : index
    %c0_1 = arith.constant 0 : index
    %0 = vector.load %arg2[%c0, %c0_0, %c0_1] : memref<1x32x16xf32, #tpu.memory_space<vmem>>, vector<1x32x16xf32>
    %1 = vector.shape_cast %0 : vector<1x32x16xf32> to vector<32x16xf32>
    %c0_2 = arith.constant 0 : index
    %c0_3 = arith.constant 0 : index
    %2 = vector.load %arg3[%c0_2, %c0_3] : memref<32x32xbf16, #tpu.memory_space<vmem>>, vector<32x32xbf16>
    %3 = arith.truncf %1 : vector<32x16xf32> to vector<32x16xbf16>
    %cst = arith.constant dense<0.000000e+00> : vector<32x16xf32>
    %4 = tpu.matmul %2, %3, %cst {dimension_numbers = #tpu.dot_dimension_numbers<[1], [0], [0], [1], [0, 0, 1, 1], [], []>} : vector<32x32xbf16>, vector<32x16xbf16>, vector<32x16xf32> -> vector<32x16xf32>
    %c0_4 = arith.constant 0 : index
    %c0_5 = arith.constant 0 : index
    %5 = vector.load %arg4[%c0_4, %c0_5] : memref<32x1xf32, #tpu.memory_space<vmem>>, vector<32x1xf32>
    %6 = vector.broadcast %5 : vector<32x1xf32> to vector<32x16xf32>
    %7 = arith.addf %4, %6 : vector<32x16xf32>
    %cst_6 = arith.constant dense<0.000000e+00> : vector<16xf32>
    %8 = vector.multi_reduction <add>, %7, %cst_6 [0] : vector<32x16xf32> to vector<16xf32>
    %9 = vector.shape_cast %8 : vector<16xf32> to vector<1x16xf32>
    %cst_7 = arith.constant 3.200000e+01 : f32
    %10 = vector.broadcast %cst_7 : f32 to vector<1x16xf32>
    %11 = arith.divf %9, %10 : vector<1x16xf32>
    %12 = arith.mulf %7, %7 : vector<32x16xf32>
    %cst_8 = arith.constant dense<0.000000e+00> : vector<16xf32>
    %13 = vector.multi_reduction <add>, %12, %cst_8 [0] : vector<32x16xf32> to vector<16xf32>
    %14 = vector.shape_cast %13 : vector<16xf32> to vector<1x16xf32>
    %cst_9 = arith.constant 3.200000e+01 : f32
    %15 = vector.broadcast %cst_9 : f32 to vector<1x16xf32>
    %16 = arith.divf %14, %15 : vector<1x16xf32>
    %17 = arith.mulf %11, %11 : vector<1x16xf32>
    %18 = arith.subf %16, %17 : vector<1x16xf32>
    %19 = vector.broadcast %11 : vector<1x16xf32> to vector<32x16xf32>
    %20 = arith.subf %7, %19 : vector<32x16xf32>
    %cst_10 = arith.constant 9.99999974E-6 : f32
    %21 = vector.broadcast %cst_10 : f32 to vector<1x16xf32>
    %22 = arith.addf %18, %21 : vector<1x16xf32>
    %23 = math.rsqrt %22 : vector<1x16xf32>
    %24 = vector.broadcast %23 : vector<1x16xf32> to vector<32x16xf32>
    %25 = arith.mulf %20, %24 : vector<32x16xf32>
    %c0_11 = arith.constant 0 : index
    %c0_12 = arith.constant 0 : index
    %26 = vector.load %arg5[%c0_11, %c0_12] : memref<32x1xf32, #tpu.memory_space<vmem>>, vector<32x1xf32>
    %27 = vector.broadcast %26 : vector<32x1xf32> to vector<32x16xf32>
    %28 = arith.mulf %25, %27 : vector<32x16xf32>
    %c0_13 = arith.constant 0 : index
    %c0_14 = arith.constant 0 : index
    %29 = vector.load %arg6[%c0_13, %c0_14] : memref<32x1xf32, #tpu.memory_space<vmem>>, vector<32x1xf32>
    %30 = vector.broadcast %29 : vector<32x1xf32> to vector<32x16xf32>
    %31 = arith.addf %28, %30 : vector<32x16xf32>
    %cst_15 = arith.constant 0.000000e+00 : f32
    %32 = vector.broadcast %cst_15 : f32 to vector<32x16xf32>
    %33 = arith.maximumf %31, %32 : vector<32x16xf32>
    %c0_16 = arith.constant 0 : index
    %c0_17 = arith.constant 0 : index
    %34 = vector.load %arg7[%c0_16, %c0_17] : memref<32x32xbf16, #tpu.memory_space<vmem>>, vector<32x32xbf16>
    %35 = arith.truncf %33 : vector<32x16xf32> to vector<32x16xbf16>
    %cst_18 = arith.constant dense<0.000000e+00> : vector<32x16xf32>
    %36 = tpu.matmul %34, %35, %cst_18 {dimension_numbers = #tpu.dot_dimension_numbers<[1], [0], [0], [1], [0, 0, 1, 1], [], []>} : vector<32x32xbf16>, vector<32x16xbf16>, vector<32x16xf32> -> vector<32x16xf32>
    %c0_19 = arith.constant 0 : index
    %c0_20 = arith.constant 0 : index
    %37 = vector.load %arg8[%c0_19, %c0_20] : memref<32x1xf32, #tpu.memory_space<vmem>>, vector<32x1xf32>
    %38 = vector.broadcast %37 : vector<32x1xf32> to vector<32x16xf32>
    %39 = arith.addf %36, %38 : vector<32x16xf32>
    %cst_21 = arith.constant dense<0.000000e+00> : vector<16xf32>
    %40 = vector.multi_reduction <add>, %39, %cst_21 [0] : vector<32x16xf32> to vector<16xf32>
    %41 = vector.shape_cast %40 : vector<16xf32> to vector<1x16xf32>
    %cst_22 = arith.constant 3.200000e+01 : f32
    %42 = vector.broadcast %cst_22 : f32 to vector<1x16xf32>
    %43 = arith.divf %41, %42 : vector<1x16xf32>
    %44 = arith.mulf %39, %39 : vector<32x16xf32>
    %cst_23 = arith.constant dense<0.000000e+00> : vector<16xf32>
    %45 = vector.multi_reduction <add>, %44, %cst_23 [0] : vector<32x16xf32> to vector<16xf32>
    %46 = vector.shape_cast %45 : vector<16xf32> to vector<1x16xf32>
    %cst_24 = arith.constant 3.200000e+01 : f32
    %47 = vector.broadcast %cst_24 : f32 to vector<1x16xf32>
    %48 = arith.divf %46, %47 : vector<1x16xf32>
    %49 = arith.mulf %43, %43 : vector<1x16xf32>
    %50 = arith.subf %48, %49 : vector<1x16xf32>
    %51 = vector.broadcast %43 : vector<1x16xf32> to vector<32x16xf32>
    %52 = arith.subf %39, %51 : vector<32x16xf32>
    %cst_25 = arith.constant 9.99999974E-6 : f32
    %53 = vector.broadcast %cst_25 : f32 to vector<1x16xf32>
    %54 = arith.addf %50, %53 : vector<1x16xf32>
    %55 = math.rsqrt %54 : vector<1x16xf32>
    %56 = vector.broadcast %55 : vector<1x16xf32> to vector<32x16xf32>
    %57 = arith.mulf %52, %56 : vector<32x16xf32>
    %c0_26 = arith.constant 0 : index
    %c0_27 = arith.constant 0 : index
    %58 = vector.load %arg9[%c0_26, %c0_27] : memref<32x1xf32, #tpu.memory_space<vmem>>, vector<32x1xf32>
    %59 = vector.broadcast %58 : vector<32x1xf32> to vector<32x16xf32>
    %60 = arith.mulf %57, %59 : vector<32x16xf32>
    %c0_28 = arith.constant 0 : index
    %c0_29 = arith.constant 0 : index
    %61 = vector.load %arg10[%c0_28, %c0_29] : memref<32x1xf32, #tpu.memory_space<vmem>>, vector<32x1xf32>
    %62 = vector.broadcast %61 : vector<32x1xf32> to vector<32x16xf32>
    %63 = arith.addf %60, %62 : vector<32x16xf32>
    %cst_30 = arith.constant 0.000000e+00 : f32
    %64 = vector.broadcast %cst_30 : f32 to vector<32x16xf32>
    %65 = arith.maximumf %63, %64 : vector<32x16xf32>
    %66 = arith.addf %65, %1 : vector<32x16xf32>
    %c0_31 = arith.constant 0 : index
    %c0_32 = arith.constant 0 : index
    %c0_33 = arith.constant 0 : index
    %67 = vector.load %arg11[%c0_31, %c0_32, %c0_33] : memref<1x32x16xf32, #tpu.memory_space<vmem>>, vector<1x32x16xf32>
    %68 = vector.shape_cast %67 : vector<1x32x16xf32> to vector<32x16xf32>
    %69 = vector.shape_cast %66 : vector<32x16xf32> to vector<1x32x16xf32>
    tpu.vector_store %arg11[%c0_31, %c0_32, %c0_33], %69 {strides = array<i32>} : memref<1x32x16xf32, #tpu.memory_space<vmem>>, vector<1x32x16xf32>,
    return
  }
  func.func @transform_0(%arg0: i32, %arg1: i32) -> (i32, i32, i32) {
    %c0_i32 = arith.constant 0 : i32
    %c0_i32_0 = arith.constant 0 : i32
    return %arg0, %c0_i32, %arg1 : i32, i32, i32
  }
  func.func @transform_1(%arg0: i32, %arg1: i32) -> (i32, i32) {
    %c0_i32 = arith.constant 0 : i32
    %c0_i32_0 = arith.constant 0 : i32
    %c0_i32_1 = arith.constant 0 : i32
    return %c0_i32, %c0_i32_0 : i32, i32
  }
  func.func @transform_2(%arg0: i32, %arg1: i32) -> (i32, i32) {
    %c0_i32 = arith.constant 0 : i32
    %c0_i32_0 = arith.constant 0 : i32
    %c0_i32_1 = arith.constant 0 : i32
    return %c0_i32, %c0_i32_0 : i32, i32
  }
  func.func @transform_3(%arg0: i32, %arg1: i32) -> (i32, i32) {
    %c0_i32 = arith.constant 0 : i32
    %c0_i32_0 = arith.constant 0 : i32
    %c0_i32_1 = arith.constant 0 : i32
    return %c0_i32, %c0_i32_0 : i32, i32
  }
  func.func @transform_4(%arg0: i32, %arg1: i32) -> (i32, i32) {
    %c0_i32 = arith.constant 0 : i32
    %c0_i32_0 = arith.constant 0 : i32
    %c0_i32_1 = arith.constant 0 : i32
    return %c0_i32, %c0_i32_0 : i32, i32
  }
  func.func @transform_5(%arg0: i32, %arg1: i32) -> (i32, i32) {
    %c0_i32 = arith.constant 0 : i32
    %c0_i32_0 = arith.constant 0 : i32
    %c0_i32_1 = arith.constant 0 : i32
    return %c0_i32, %c0_i32_0 : i32, i32
  }
  func.func @transform_6(%arg0: i32, %arg1: i32) -> (i32, i32) {
    %c0_i32 = arith.constant 0 : i32
    %c0_i32_0 = arith.constant 0 : i32
    %c0_i32_1 = arith.constant 0 : i32
    return %c0_i32, %c0_i32_0 : i32, i32
  }
  func.func @transform_7(%arg0: i32, %arg1: i32) -> (i32, i32) {
    %c0_i32 = arith.constant 0 : i32
    %c0_i32_0 = arith.constant 0 : i32
    %c0_i32_1 = arith.constant 0 : i32
    return %c0_i32, %c0_i32_0 : i32, i32
  }
  func.func @transform_8(%arg0: i32, %arg1: i32) -> (i32, i32) {
    %c0_i32 = arith.constant 0 : i32
    %c0_i32_0 = arith.constant 0 : i32
    %c0_i32_1 = arith.constant 0 : i32
    return %c0_i32, %c0_i32_0 : i32, i32
  }
  func.func @transform_9(%arg0: i32, %arg1: i32) -> (i32, i32, i32) {
    %c0_i32 = arith.constant 0 : i32
    %c0_i32_0 = arith.constant 0 : i32
    return %arg0, %c0_i32, %arg1 : i32, i32, i32
  }
}

</mosaic_0001>

<bundles_post_ra>
// kernel: tpu_custom_call.1
= control target key start
LH: loop header
LB: loop body
LE: loop exit
PB: predicated region body
PF: predicated region fallthrough
CT: control target
= control target key end

     0   :  { %s977_s30 = smov 0   ;;  %s979_s10 = smov 0   ;;  %s1171_s0 = inlined_call_operand.vmem [shape: f32[2,32,16], index: 0, kind: input, shape index: {}]   ;;  %s1172_s1 = inlined_call_operand.vmem [shape: bf16[32,32], index: 1, kind: input, shape index: {}]   ;;  %s1173_s2 = inlined_call_operand.vmem [shape: f32[32,1], index: 2, kind: input, shape index: {}]   ;;  %s1174_s3 = inlined_call_operand.vmem [shape: f32[32,1], index: 3, kind: input, shape index: {}]   ;;  %s1175_s4 = inlined_call_operand.vmem [shape: f32[32,1], index: 4, kind: input, shape index: {}]   ;;  %s1176_s5 = inlined_call_operand.vmem [shape: bf16[32,32], index: 5, kind: input, shape index: {}]   ;;  %s1177_s6 = inlined_call_operand.vmem [shape: f32[32,1], index: 6, kind: input, shape index: {}]   ;;  %s1178_s7 = inlined_call_operand.vmem [shape: f32[32,1], index: 7, kind: input, shape index: {}]   ;;  %s1179_s8 = inlined_call_operand.vmem [shape: f32[32,1], index: 8, kind: input, shape index: {}]   ;;  %s1180_s9 = inlined_call_operand.vmem [shape: f32[2,32,16], index: 9, kind: output, shape index: {}]  }
   0x1   :  { %s981_s11 = smov 0  }
   0x2 LB: > { %s31_s12 = sadd.s32 1, %s919_s10  ;;  %p829_p0 = scmp.ge.s32.totalorder %s923_s11, 1  ;;  %s923_s11 = sphi %s981_s11, %s19_s11   ;;  %s919_s10 = sphi %s979_s10, %s1182_s10   ;;  %s915_s30 = sphi %s977_s30, %s1181_s30  }
   0x3   : > { %p33_p1 = scmp.ge.s32.totalorder %s31_s12, 2  ;;  %p306_p2 = scmp.lt.s32.totalorder %s923_s11, 3 }
   0x5   : > { %s1184_s12 = smov (%p33_p1, %s31_s12), 0  ;;  %p307_p3 = pnand %p829_p0, %p306_p2 }
   0x6   : > { %p348_p4 = scmp.lt.s32.totalorder (!%p307_p3), %s915_s30, 1 }
   0x7   : > { %310 = sbr.rel (%p307_p3) target bundleno = 423 (0x1a7), region = 56 }
   0xc   : > { %v377_v0 = vld [vmem:[%s1173_s2 + $0x10] sm:$0xff]  ;;  %v375_v1 = vld [vmem:[%s1173_s2] sm:$0xff]  ;;  %v925_v2 = vmov 0   ;;  %s1186_s30 = smov (!%p348_p4, %s915_s30), 1  ;;  %v378_v8 = vld [vmem:[%s1173_s2 + $0x18] sm:$0xff]  ;;  %vm409_vm0 = vcmask 261120  }
   0xd   : > { %893 = vset.pattern.permute.xlu1 %v925_v2  ;;  %892 = vset.pattern.permute.xlu0 %v925_v2  ;;  %s856_s17 = sshll.u32 %s1186_s30, 5  ;;  %v498_v3 = vld [vmem:[%s1174_s3 + $0x10] sm:$0xff]  ;;  %v376_v9 = vld [vmem:[%s1173_s2 + $0x8] sm:$0xff]  ;;  %v499_v12 = vld [vmem:[%s1174_s3 + $0x18] sm:$0xff]  ;;  %v926_v36 = vmov 32.0   ;;  %vm435_vm1 = vcmask 130048  }
   0xe   : > { %391 = vperm.xlu1 %893, %v377_v0   ;;  %381 = vperm.xlu0 %892, %v375_v1   ;;  %s355_s22 = scalar_lea.vmem %s1171_s0, %s856_s17  ;;  %v858_v13 = vld [vmem:[%s1172_s1] sm:$0xff]  ;;  %v859_v14 = vld [vmem:[%s1172_s1 + $0x8] sm:$0xff]  ;;  %v527_v15 = vld [vmem:[%s1175_s4 + $0x18] sm:$0xff]  ;;  %895 = vrcp.f32 %v926_v36  ;;  %s363_s27 = scalar_lea.vmem %s1180_s9, %s856_s17 }
   0xf   : > { %894 = vset.pattern.permute.xlu2 %v925_v2  ;;  %v1012_v4 = vld [vmem:[%s355_s22 + $0x10] sm:$0xff]  ;;  %v1014_v5 = vld [vmem:[%s355_s22 + $0x18] sm:$0xff]  ;;  %v1016_v6 = vld [vmem:[%s355_s22] sm:$0xff] }
  0x10   : > { %512 = vperm.xlu2 %894, %v498_v3   ;;  %v374_v7 = vpack.c.bf16 %v1014_v5, %v1012_v4  ;;  %v1026_v10 = vld [vmem:[%s355_s22 + $0x8] sm:$0xff]  ;;  %v526_v16 = vld [vmem:[%s1175_s4 + $0x10] sm:$0xff]  ;;  %v496_v17 = vld [vmem:[%s1174_s3] sm:$0xff] }
  0x11   : > { %v373_v11 = vpack.c.bf16 %v1026_v10, %v1016_v6  ;;  %v524_v18 = vld [vmem:[%s1175_s4] sm:$0xff]  ;;  %v497_v19 = vld [vmem:[%s1174_s3 + $0x8] sm:$0xff]  ;;  %v564_v23 = vld [vmem:[%s1177_s6 + $0x10] sm:$0xff] }
  0x12   : > { %422 = vmatpush.bf16.msra.mxu0 %v374_v7  ;;  %862 = vmatpush.bf16.msra.mxu2 %v374_v7  ;;  %v525_v20 = vld [vmem:[%s1175_s4 + $0x8] sm:$0xff]  ;;  %v562_v22 = vld [vmem:[%s1177_s6] sm:$0xff]  ;;  %v565_v25 = vld [vmem:[%s1177_s6 + $0x18] sm:$0xff] }
  0x13   : > { %v563_v21 = vld [vmem:[%s1177_s6 + $0x8] sm:$0xff]  ;;  %v674_v24 = vld [vmem:[%s1178_s7] sm:$0xff]  ;;  %v677_v27 = vld [vmem:[%s1178_s7 + $0x18] sm:$0xff] }
  0x14   : > { %v675_v26 = vld [vmem:[%s1178_s7 + $0x8] sm:$0xff]  ;;  %v676_v28 = vld [vmem:[%s1178_s7 + $0x10] sm:$0xff]  ;;  %v702_v29 = vld [vmem:[%s1179_s8] sm:$0xff]  ;;  %v896_v44 = vpop.eup %895 }
  0x15   : > { %v704_v30 = vld [vmem:[%s1179_s8 + $0x10] sm:$0xff]  ;;  %v703_v31 = vld [vmem:[%s1179_s8 + $0x8] sm:$0xff]  ;;  %v705_v32 = vld [vmem:[%s1179_s8 + $0x18] sm:$0xff]  ;;  %v450_v52 = vmul.f32 32.0, %v896_v44  ;;  %vm454_vm2 = vweird.f32 %v896_v44 }
  0x16   : > { %396 = vperm.xlu1 %893, %v378_v8   ;;  %386 = vperm.xlu0 %892, %v376_v9  }
  0x17   : > { %423 = vmatpush.bf16.msra.mxu0 %v373_v11  ;;  %863 = vmatpush.bf16.msra.mxu2 %v373_v11  ;;  %v451_v61 = vsub.f32 1.0, %v450_v52 }
  0x18   : > { %517 = vperm.xlu2 %894, %v499_v12  }
  0x19   : > { %v452_v7 = vmul.f32 %v896_v44, %v451_v61 }
  0x1a   : > { %842 = vmatmul.msk.bf16.vlgmr.msra.gmra.mxu0 %vm409_vm0, %v858_v13  ;;  %843 = vmatmul.msk.bf16.vlgmr.msra.gmra.mxu2 %vm409_vm0, %v859_v14 }
  0x1b   : > { %v453_v13 = vadd.f32 %v896_v44, %v452_v7 }
  0x1e   : > { %545 = vperm.xlu1 %893, %v527_v15   ;;  %540 = vperm.xlu0 %892, %v526_v16  }
  0x20   : > { %502 = vperm.xlu2 %894, %v496_v17  }
  0x26   : > { %530 = vperm.xlu1 %893, %v524_v18   ;;  %507 = vperm.xlu0 %892, %v497_v19   ;;  %v1118_v18 = vsel %vm454_vm2, %v896_v44, %v453_v13 }
  0x28   : > { %535 = vperm.xlu2 %894, %v525_v20  }
  0x2e   : > { %573 = vperm.xlu1 %893, %v563_v21   ;;  %568 = vperm.xlu0 %892, %v562_v22  }
  0x30   : > { %578 = vperm.xlu2 %894, %v564_v23  }
  0x36   : > { %680 = vperm.xlu1 %893, %v674_v24   ;;  %583 = vperm.xlu0 %892, %v565_v25  }
  0x38   : > { %685 = vperm.xlu2 %894, %v675_v26  }
  0x3e   : > { %695 = vperm.xlu1 %893, %v677_v27   ;;  %690 = vperm.xlu0 %892, %v676_v28  }
  0x40   : > { %708 = vperm.xlu2 %894, %v702_v29  }
  0x46   : > { %718 = vperm.xlu1 %893, %v704_v30   ;;  %713 = vperm.xlu0 %892, %v703_v31  }
  0x48   : > { %723 = vperm.xlu2 %894, %v705_v32  }
  0x6a   : > { %v513_v21 = vpop.permute.xlu2 %512 }
  0x72   : > { %v518_v28 = vpop.permute.xlu2 %517 }
  0x80   : > { %v382_v33 = vpop.permute.xlu0 %381  ;;  %v392_v35 = vpop.permute.xlu1 %391 }
  0x88   : > { %v387_v39 = vpop.permute.xlu0 %386  ;;  %v397_v53 = vpop.permute.xlu1 %396 }
  0x90   : > { %v541_v31 = vpop.permute.xlu0 %540 }
  0x97   : > { %v425_v34 = vpop.f32.mrf.mxu0 }
  0x98   : > { %v1095_v37 = vadd.f32 %v425_v34, %v382_v33  ;;  %v546_v33 = vpop.permute.xlu1 %545  ;;  %v503_v34 = vpop.permute.xlu2 %502 }
  0x9a   : > { %v457_v41 = vmul.f32 %v1095_v37, %v1095_v37  ;;  %v436_v45 = vsel %vm435_vm1, %v1095_v37, 0.0 }
  0x9c   : > { %v461_v49 = vsel %vm435_vm1, %v457_v41, 0.0 }
  0x9d   : > { %v430_v38 = vpop.f32.mrf.mxu2 }
  0x9e   : > { %v1099_v42 = vadd.f32 %v430_v38, %v392_v35 }
  0x9f   : > { %v427_v40 = vpop.f32.mrf.mxu0 }
  0xa0   : > { %v1101_v43 = vadd.f32 %v427_v40, %v387_v39  ;;  %v459_v50 = vmul.f32 %v1099_v42, %v1099_v42  ;;  %v439_v56 = vsel %vm435_vm1, %v1099_v42, 0.0 }
  0xa2   : > { %v437_v46 = vsel %vm435_vm1, %v1101_v43, 0.0  ;;  %v458_v47 = vmul.f32 %v1101_v43, %v1101_v43  ;;  %v464_v59 = vsel %vm435_vm1, %v459_v50, 0.0  ;;  %v508_v50 = vpop.permute.xlu0 %507 }
  0xa3   : > { %v438_v48 = vadd.f32 %v437_v46, %v436_v45 }
  0xa4   : > { %v462_v51 = vsel %vm435_vm1, %v458_v47, 0.0 }
  0xa5   : > { %v463_v54 = vadd.f32 %v462_v51, %v461_v49  ;;  %v432_v55 = vpop.f32.mrf.mxu2  ;;  %v440_v58 = vadd.f32 %v439_v56, %v438_v48  ;;  %v536_v56 = vpop.permute.xlu2 %535 }
  0xa6   : > { %v433_v57 = vadd.f32 %v432_v55, %v397_v53  ;;  %v531_v55 = vpop.permute.xlu1 %530 }
  0xa7   : > { %v465_v0 = vadd.f32 %v464_v59, %v463_v54 }
  0xa8   : > { %v441_v60 = vsel %vm435_vm1, %v433_v57, 0.0  ;;  %v460_v62 = vmul.f32 %v433_v57, %v433_v57 }
  0xa9   : > { %v442_v63 = vadd.f32 %v441_v60, %v440_v58 }
  0xaa   : > { %v466_v1 = vsel %vm435_vm1, %v460_v62, 0.0 }
  0xab   : > { %v443_v2 = vrot.slane %v442_v63, 4  ;;  %v467_v3 = vadd.f32 %v466_v1, %v465_v0  ;;  %v860_v0 = vld [vmem:[%s1176_s5] sm:$0xff]  ;;  %v861_v1 = vld [vmem:[%s1176_s5 + $0x8] sm:$0xff] }
  0xad   : > { %v444_v8 = vadd.f32 %v443_v2, %v442_v63  ;;  %v468_v9 = vrot.slane %v467_v3, 4 }
  0xaf   : > { %v445_v11 = vrot.slane %v444_v8, 2  ;;  %v469_v12 = vadd.f32 %v468_v9, %v467_v3  ;;  %v569_v3 = vpop.permute.xlu0 %568  ;;  %v579_v9 = vpop.permute.xlu2 %578 }
  0xb1   : > { %v446_v14 = vadd.f32 %v445_v11, %v444_v8  ;;  %v470_v15 = vrot.slane %v469_v12, 2  ;;  %v574_v11 = vpop.permute.xlu1 %573 }
  0xb3   : > { %v447_v16 = vrot.slane %v446_v14, 1  ;;  %v471_v17 = vadd.f32 %v470_v15, %v469_v12 }
  0xb5   : > { %v448_v19 = vadd.f32 %v447_v16, %v446_v14  ;;  %v472_v20 = vrot.slane %v471_v17, 1 }
  0xb7   : > { %v456_v22 = vmul.f32 %v1118_v18, %v448_v19  ;;  %v473_v23 = vadd.f32 %v472_v20, %v471_v17 }
  0xb9   : > { %v474_v24 = vmul.f32 %v473_v23, %v1118_v18  ;;  %v475_v25 = vmul.f32 %v456_v22, %v456_v22  ;;  %v480_v39 = vsub.f32 %v433_v57, %v456_v22  ;;  %v479_v40 = vsub.f32 %v1099_v42, %v456_v22 }
  0xba   : > { %v477_v41 = vsub.f32 %v1095_v37, %v456_v22  ;;  %v478_v44 = vsub.f32 %v1101_v43, %v456_v22 }
  0xbb   : > { %v476_v26 = vsub.f32 %v474_v24, %v475_v25  ;;  %v584_v24 = vpop.permute.xlu0 %583 }
  0xbd   : > { %v481_v27 = vadd.f32 1e-05, %v476_v26 }
  0xbf   : > { %897 = vrsqrt.f32 %v481_v27  ;;  %vm488_vm4 = vweird.f32 %v481_v27 }
  0xc5   : > { %v898_v29 = vpop.eup %897 }
  0xc6   : > { %v483_v30 = vmul.f32 %v898_v29, %v481_v27  ;;  %vm489_vm3 = vweird.f32 %v898_v29 }
  0xc7   : > { %vm490_vm5 = vmor %vm488_vm4, %vm489_vm3 }
  0xc8   : > { %v484_v32 = vmul.f32 %v898_v29, %v483_v30 }
  0xca   : > { %v485_v35 = vmul.f32 0.5, %v484_v32 }
  0xcc   : > { %v486_v36 = vsub.f32 1.5, %v485_v35 }
  0xce   : > { %v487_v38 = vmul.f32 %v898_v29, %v486_v36 }
  0xd0   : > { %v491_v45 = vsel %vm490_vm5, %v898_v29, %v487_v38 }
  0xd1   : > { %v495_v46 = vmul.f32 %v491_v45, %v480_v39  ;;  %v494_v47 = vmul.f32 %v491_v45, %v479_v40  ;;  %v492_v48 = vmul.f32 %v491_v45, %v477_v41  ;;  %v493_v49 = vmul.f32 %v491_v45, %v478_v44 }
  0xd3   : > { %v522_v51 = vmul.f32 %v513_v21, %v494_v47  ;;  %v523_v52 = vmul.f32 %v518_v28, %v495_v46  ;;  %v520_v53 = vmul.f32 %v503_v34, %v492_v48  ;;  %v521_v54 = vmul.f32 %v508_v50, %v493_v49 }
  0xd5   : > { %v550_v57 = vadd.f32 %v541_v31, %v522_v51  ;;  %v551_v58 = vadd.f32 %v546_v33, %v523_v52  ;;  %v548_v59 = vadd.f32 %v531_v55, %v520_v53  ;;  %v549_v42 = vadd.f32 %v536_v56, %v521_v54 }
  0xd7   : > { %v554_v60 = vmax.f32 %v550_v57, 0.0  ;;  %v555_v37 = vmax.f32 %v551_v58, 0.0  ;;  %v552_v43 = vmax.f32 %v548_v59, 0.0  ;;  %v553_v62 = vmax.f32 %v549_v42, 0.0  ;;  %v686_v57 = vpop.permute.xlu2 %685  ;;  %v681_v58 = vpop.permute.xlu1 %680 }
  0xd9   : > { %v561_v61 = vpack.c.bf16 %v555_v37, %v554_v60  ;;  %v560_v63 = vpack.c.bf16 %v553_v62, %v552_v43  ;;  %v691_v43 = vpop.permute.xlu0 %690 }
  0xdb   : > { %608 = vmatpush.bf16.msra.mxu1 %v561_v61  ;;  %864 = vmatpush.bf16.msra.mxu3 %v561_v61 }
  0xdf   : > { %609 = vmatpush.bf16.msra.mxu1 %v560_v63  ;;  %865 = vmatpush.bf16.msra.mxu3 %v560_v63  ;;  %v709_v37 = vpop.permute.xlu2 %708  ;;  %v696_v61 = vpop.permute.xlu1 %695 }
  0xe2   : > { %852 = vmatmul.msk.bf16.vlgmr.msra.gmra.mxu1 %vm409_vm0, %v860_v0  ;;  %853 = vmatmul.msk.bf16.vlgmr.msra.gmra.mxu3 %vm409_vm0, %v861_v1 }
 0x15f   : > { %v611_v2 = vpop.f32.mrf.mxu1 }
 0x160   : > { %v1133_v7 = vadd.f32 %v611_v2, %v569_v3 }
 0x162   : > { %v635_v13 = vmul.f32 %v1133_v7, %v1133_v7  ;;  %v621_v16 = vsel %vm435_vm1, %v1133_v7, 0.0 }
 0x164   : > { %v639_v21 = vsel %vm435_vm1, %v635_v13, 0.0 }
 0x165   : > { %v616_v8 = vpop.f32.mrf.mxu3 }
 0x166   : > { %v617_v14 = vadd.f32 %v616_v8, %v579_v9 }
 0x167   : > { %v613_v12 = vpop.f32.mrf.mxu1 }
 0x168   : > { %v614_v15 = vadd.f32 %v613_v12, %v574_v11  ;;  %v637_v22 = vmul.f32 %v617_v14, %v617_v14  ;;  %v624_v27 = vsel %vm435_vm1, %v617_v14, 0.0 }
 0x16a   : > { %v622_v17 = vsel %vm435_vm1, %v614_v15, 0.0  ;;  %v636_v19 = vmul.f32 %v614_v15, %v614_v15  ;;  %v642_v30 = vsel %vm435_vm1, %v637_v22, 0.0  ;;  %v719_v22 = vpop.permute.xlu1 %718 }
 0x16b   : > { %v623_v20 = vadd.f32 %v622_v17, %v621_v16  ;;  %v724_v16 = vpop.permute.xlu2 %723 }
 0x16c   : > { %v640_v23 = vsel %vm435_vm1, %v636_v19, 0.0 }
 0x16d   : > { %v641_v25 = vadd.f32 %v640_v23, %v639_v21  ;;  %v618_v26 = vpop.f32.mrf.mxu3  ;;  %v625_v29 = vadd.f32 %v624_v27, %v623_v20  ;;  %v714_v23 = vpop.permute.xlu0 %713 }
 0x16e   : > { %v619_v28 = vadd.f32 %v618_v26, %v584_v24 }
 0x16f   : > { %v643_v34 = vadd.f32 %v642_v30, %v641_v25 }
 0x170   : > { %v626_v31 = vsel %vm435_vm1, %v619_v28, 0.0  ;;  %v638_v32 = vmul.f32 %v619_v28, %v619_v28 }
 0x171   : > { %v627_v33 = vadd.f32 %v626_v31, %v625_v29 }
 0x172   : > { %v644_v35 = vsel %vm435_vm1, %v638_v32, 0.0 }
 0x173   : > { %v628_v36 = vrot.slane %v627_v33, 4  ;;  %v645_v38 = vadd.f32 %v644_v35, %v643_v34 }
 0x175   : > { %v629_v39 = vadd.f32 %v628_v36, %v627_v33  ;;  %v646_v40 = vrot.slane %v645_v38, 4 }
 0x177   : > { %v630_v41 = vrot.slane %v629_v39, 2  ;;  %v647_v44 = vadd.f32 %v646_v40, %v645_v38 }
 0x179   : > { %v631_v45 = vadd.f32 %v630_v41, %v629_v39  ;;  %v648_v46 = vrot.slane %v647_v44, 2 }
 0x17b   : > { %v632_v47 = vrot.slane %v631_v45, 1  ;;  %v649_v48 = vadd.f32 %v648_v46, %v647_v44 }
 0x17d   : > { %v633_v49 = vadd.f32 %v632_v47, %v631_v45  ;;  %v650_v50 = vrot.slane %v649_v48, 1 }
 0x17f   : > { %v634_v51 = vmul.f32 %v633_v49, %v1118_v18  ;;  %v651_v52 = vadd.f32 %v650_v50, %v649_v48 }
 0x181   : > { %v652_v53 = vmul.f32 %v651_v52, %v1118_v18  ;;  %v653_v54 = vmul.f32 %v634_v51, %v634_v51  ;;  %v655_v1 = vsub.f32 %v1133_v7, %v634_v51  ;;  %v656_v18 = vsub.f32 %v614_v15, %v634_v51 }
 0x182   : > { %v657_v2 = vsub.f32 %v617_v14, %v634_v51  ;;  %v658_v3 = vsub.f32 %v619_v28, %v634_v51 }
 0x183   : > { %v654_v55 = vsub.f32 %v652_v53, %v653_v54 }
 0x185   : > { %v659_v56 = vadd.f32 1e-05, %v654_v55 }
 0x187   : > { %899 = vrsqrt.f32 %v659_v56  ;;  %vm666_vm7 = vweird.f32 %v659_v56 }
 0x18d   : > { %v900_v59 = vpop.eup %899 }
 0x18e   : > { %v661_v42 = vmul.f32 %v900_v59, %v659_v56  ;;  %vm667_vm6 = vweird.f32 %v900_v59 }
 0x18f   : > { %vm668_vm8 = vmor %vm666_vm7, %vm667_vm6 }
 0x190   : > { %v662_v60 = vmul.f32 %v900_v59, %v661_v42 }
 0x192   : > { %v663_v62 = vmul.f32 0.5, %v662_v60 }
 0x194   : > { %v664_v63 = vsub.f32 1.5, %v663_v62 }
 0x196   : > { %v665_v0 = vmul.f32 %v900_v59, %v664_v63 }
 0x198   : > { %v669_v8 = vsel %vm668_vm8, %v900_v59, %v665_v0 }
 0x199   : > { %v670_v9 = vmul.f32 %v669_v8, %v655_v1  ;;  %v671_v11 = vmul.f32 %v669_v8, %v656_v18  ;;  %v672_v12 = vmul.f32 %v669_v8, %v657_v2  ;;  %v673_v13 = vmul.f32 %v669_v8, %v658_v3 }
 0x19b   : > { %v698_v17 = vmul.f32 %v681_v58, %v670_v9  ;;  %v699_v19 = vmul.f32 %v686_v57, %v671_v11  ;;  %v700_v20 = vmul.f32 %v691_v43, %v672_v12  ;;  %v701_v21 = vmul.f32 %v696_v61, %v673_v13 }
 0x19d   : > { %v726_v24 = vadd.f32 %v709_v37, %v698_v17  ;;  %v727_v25 = vadd.f32 %v714_v23, %v699_v19  ;;  %v728_v7 = vadd.f32 %v719_v22, %v700_v20  ;;  %v729_v15 = vadd.f32 %v724_v16, %v701_v21 }
 0x19f   : > { %v730_v14 = vmax.f32 %v726_v24, 0.0  ;;  %v731_v26 = vmax.f32 %v727_v25, 0.0  ;;  %v732_v27 = vmax.f32 %v728_v7, 0.0  ;;  %v733_v28 = vmax.f32 %v729_v15, 0.0 }
 0x1a1   : > { %v734_v29 = vadd.f32 %v730_v14, %v1016_v6  ;;  %v735_v30 = vadd.f32 %v731_v26, %v1026_v10  ;;  %v736_v31 = vadd.f32 %v732_v27, %v1012_v4  ;;  %v737_v32 = vadd.f32 %v733_v28, %v1014_v5 }
 0x1a3   : > { %738 = vst.msk [vmem:[%s363_s27] sm:$0xff] %vm435_vm1, %v734_v29 }
 0x1a4   : > { %739 = vst.msk [vmem:[%s363_s27 + $0x8] sm:$0xff] %vm435_vm1, %v735_v30 }
 0x1a5   : > { %740 = vst.msk [vmem:[%s363_s27 + $0x10] sm:$0xff] %vm435_vm1, %v736_v31 }
 0x1a6   : > { %741 = vst.msk [vmem:[%s363_s27 + $0x18] sm:$0xff] %vm435_vm1, %v737_v32 }
 0x1a7 PF: > { %s19_s11 = sadd.s32 1, %s923_s11   ;;  %s1181_s30 = smov %s919_s10 }
 0x1a8   : > { %p16_p5 = scmp.ge.s32.totalorder %s19_s11, 4   ;;  %s1182_s10 = smov %s1184_s12 }
 0x1aa   :  { %18 = sbr.rel (!%p16_p5) target bundleno = 2 (0x2), region = 86 }

</bundles_post_ra>
